<compile_context>
chip_gen: v7x
topology: tpu7x:2x2x1
jax: 0.10.0
libtpu: 0.0.40
codegen_flags: <defaults>
</compile_context>

<pallas_src>
import jax
import jax.numpy as jnp
from jax.experimental import pallas as pl
from jax.experimental.pallas import tpu as pltpu


def _make_kernel(use_vpu_path):
    def targetfc_kernel(w_ref, x_ref, b_ref, o_ref):
        # w_ref: (C_out, C_in), x_ref: (C_in, S_t), b_ref: (C_out, 1),
        # o_ref: (C_out, S_t)   -- S_t is the lane-dense (last) axis.
        w = w_ref[...]
        x = x_ref[...]
        b = b_ref[...].astype(jnp.float32)
        if use_vpu_path:
            # Tiny contraction dim: unrolled VPU FMA, fully lane-utilized,
            # avoids padding the MXU K dim to 128/256.  Start the accumulator
            # from the broadcast bias so the bias add is fused into the MAC
            # chain.
            c_in = w.shape[1]
            acc = jnp.broadcast_to(b, o_ref.shape).astype(jnp.float32)
            for i in range(c_in):  # static Python unroll (C_in is small)
                acc = acc + (w[:, i:i + 1].astype(jnp.float32)
                             * x[i:i + 1, :].astype(jnp.float32))
        else:
            acc = jnp.dot(w, x, preferred_element_type=jnp.float32) + b
        o_ref[...] = acc.astype(o_ref.dtype)
    return targetfc_kernel


def _choose_s_tile(S, C_in, C_out, itemsize, B,
                   budget_bytes=6 << 20, max_tile=4096):
    """Pick a lane-dense S tile: a multiple of 128 dividing S, sized so the
    double-buffered x/out tiles stay well inside scoped VMEM on all
    generations (incl. v7x's 32 MiB default scoped limit)."""
    if S % 128 != 0:
        # Block dim equal to the full array dim is always legal.
        # TODO(synk): allow cdiv-padded partial S tiles for ragged S.
        return S
    candidates = []
    t = 128
    while t <= min(S, max_tile):
        if S % t == 0:
            per_step = 2 * (C_in + C_out) * t * itemsize  # 2x = double-buffer
            if per_step <= budget_bytes:
                candidates.append(t)
        t += 128
    if not candidates:
        return 128
    # Prefer the largest tile that still leaves >= 4 parallel grid points
    # (keeps both v7x TensorCores fed when B is small); else largest that fits.
    big_enough = [t for t in candidates if B * (S // t) >= 4]
    return max(big_enough) if big_enough else max(candidates)


def target_fc(x, weight, bias):
    """x: (B, C_in, H, W); weight: (B, C_out, C_in, 1, 1); bias: (B, C_out)."""
    B, C_in, H, W = x.shape
    C_out = weight.shape[1]
    S = H * W

    # Layout plumbing only -- all of these are free contiguous reshapes.
    x_re = x.reshape(B, C_in, S)                 # (B, C_in, S)
    w_re = weight.reshape(B, C_out, C_in)        # (B, C_out, C_in)
    b_re = bias.reshape(B, C_out, 1)             # (B, C_out, 1)

    s_tile = _choose_s_tile(S, C_in, C_out, jnp.dtype(x.dtype).itemsize, B)
    grid = (B, S // s_tile)

    kernel = _make_kernel(use_vpu_path=(C_in <= 16))

    out = pl.pallas_call(
        kernel,
        out_shape=jax.ShapeDtypeStruct((B, C_out, S), x.dtype),
        grid=grid,
        in_specs=[
            # Per-sample weight / bias: block index invariant along the inner
            # S-tile axis, so they are fetched once per sample.
            pl.BlockSpec((None, C_out, C_in), lambda b, s: (b, 0, 0)),
            # Input tile: (C_in, s_tile) with S on the lane axis.
            pl.BlockSpec((None, C_in, s_tile), lambda b, s: (b, 0, s)),
            pl.BlockSpec((None, C_out, 1), lambda b, s: (b, 0, 0)),
        ],
        # Lane-dense output tile: last dim is s_tile (multiple of 128).
        out_specs=pl.BlockSpec((None, C_out, s_tile), lambda b, s: (b, 0, s)),
        compiler_params=pltpu.CompilerParams(
            dimension_semantics=("parallel", "parallel")),
    )(w_re, x_re, b_re)

    # Back to NCHW -- a free reshape, no transpose needed.
    return out.reshape(B, C_out, H, W)


if __name__ == "__main__":
    B, C_in, C_out, H, W = 2, 4, 8, 16, 16

    key = jax.random.PRNGKey(0)
    kx, kw, kb = jax.random.split(key, 3)
    x = jax.random.normal(kx, (B, C_in, H, W), dtype=jnp.float32)
    weight = jax.random.normal(kw, (B, C_out, C_in, 1, 1), dtype=jnp.float32) * 0.1
    bias = jax.random.normal(kb, (B, C_out), dtype=jnp.float32) * 0.1

    out = jax.block_until_ready(target_fc(x, weight, bias))

    # Reference (pure JAX) check of the per-sample 1x1 group-conv semantics.
    ref = jnp.einsum("boi,bihw->bohw", weight.reshape(B, C_out, C_in), x) \
        + bias[:, :, None, None]
    assert out.shape == (B, C_out, H, W)
    assert jnp.allclose(out, ref, atol=1e-5, rtol=1e-5)

    print("KERNEL_OK")
</pallas_src>

<mosaic_0001>
module attributes {stable_mosaic.version = 11 : i64} {
  func.func @targetfc_kernel(%arg0: i32, %arg1: i32, %arg2: memref<1x8x4xf32, #tpu.memory_space<vmem>>, %arg3: memref<1x4x128xf32, #tpu.memory_space<vmem>>, %arg4: memref<1x8x1xf32, #tpu.memory_space<vmem>>, %arg5: memref<1x8x128xf32, #tpu.memory_space<vmem>>) attributes {dimension_semantics = [#tpu.dimension_semantics<parallel>, #tpu.dimension_semantics<parallel>], iteration_bounds = array<i64: 2, 2>, scalar_prefetch = 0 : i64, scratch_operands = 0 : i64, tpu.core_type = #tpu.core_type<tc>, window_params = [{transform_indices = @transform_0, window_bounds = array<i64: 1, 8, 4>}, {transform_indices = @transform_1, window_bounds = array<i64: 1, 4, 128>}, {transform_indices = @transform_2, window_bounds = array<i64: 1, 8, 1>}, {transform_indices = @transform_3, window_bounds = array<i64: 1, 8, 128>}]} {
    %c0 = arith.constant 0 : index
    %c0_0 = arith.constant 0 : index
    %c0_1 = arith.constant 0 : index
    %0 = vector.load %arg2[%c0, %c0_0, %c0_1] : memref<1x8x4xf32, #tpu.memory_space<vmem>>, vector<1x8x4xf32>
    %1 = vector.shape_cast %0 : vector<1x8x4xf32> to vector<8x4xf32>
    %c0_2 = arith.constant 0 : index
    %c0_3 = arith.constant 0 : index
    %c0_4 = arith.constant 0 : index
    %2 = vector.load %arg3[%c0_2, %c0_3, %c0_4] : memref<1x4x128xf32, #tpu.memory_space<vmem>>, vector<1x4x128xf32>
    %3 = vector.shape_cast %2 : vector<1x4x128xf32> to vector<4x128xf32>
    %c0_5 = arith.constant 0 : index
    %c0_6 = arith.constant 0 : index
    %c0_7 = arith.constant 0 : index
    %4 = vector.load %arg4[%c0_5, %c0_6, %c0_7] : memref<1x8x1xf32, #tpu.memory_space<vmem>>, vector<1x8x1xf32>
    %5 = vector.shape_cast %4 : vector<1x8x1xf32> to vector<8x1xf32>
    %6 = vector.shape_cast %5 : vector<8x1xf32> to vector<8x1xf32>
    %7 = vector.broadcast %6 : vector<8x1xf32> to vector<8x128xf32>
    %8 = vector.extract_strided_slice %1 {offsets = [0, 0], sizes = [8, 1], strides = [1, 1]} : vector<8x4xf32> to vector<8x1xf32>
    %9 = vector.extract_strided_slice %3 {offsets = [0, 0], sizes = [1, 128], strides = [1, 1]} : vector<4x128xf32> to vector<1x128xf32>
    %10 = vector.broadcast %8 : vector<8x1xf32> to vector<8x128xf32>
    %11 = vector.broadcast %9 : vector<1x128xf32> to vector<8x128xf32>
    %12 = arith.mulf %10, %11 : vector<8x128xf32>
    %13 = arith.addf %7, %12 : vector<8x128xf32>
    %14 = vector.extract_strided_slice %1 {offsets = [0, 1], sizes = [8, 1], strides = [1, 1]} : vector<8x4xf32> to vector<8x1xf32>
    %15 = vector.extract_strided_slice %3 {offsets = [1, 0], sizes = [1, 128], strides = [1, 1]} : vector<4x128xf32> to vector<1x128xf32>
    %16 = vector.broadcast %14 : vector<8x1xf32> to vector<8x128xf32>
    %17 = vector.broadcast %15 : vector<1x128xf32> to vector<8x128xf32>
    %18 = arith.mulf %16, %17 : vector<8x128xf32>
    %19 = arith.addf %13, %18 : vector<8x128xf32>
    %20 = vector.extract_strided_slice %1 {offsets = [0, 2], sizes = [8, 1], strides = [1, 1]} : vector<8x4xf32> to vector<8x1xf32>
    %21 = vector.extract_strided_slice %3 {offsets = [2, 0], sizes = [1, 128], strides = [1, 1]} : vector<4x128xf32> to vector<1x128xf32>
    %22 = vector.broadcast %20 : vector<8x1xf32> to vector<8x128xf32>
    %23 = vector.broadcast %21 : vector<1x128xf32> to vector<8x128xf32>
    %24 = arith.mulf %22, %23 : vector<8x128xf32>
    %25 = arith.addf %19, %24 : vector<8x128xf32>
    %26 = vector.extract_strided_slice %1 {offsets = [0, 3], sizes = [8, 1], strides = [1, 1]} : vector<8x4xf32> to vector<8x1xf32>
    %27 = vector.extract_strided_slice %3 {offsets = [3, 0], sizes = [1, 128], strides = [1, 1]} : vector<4x128xf32> to vector<1x128xf32>
    %28 = vector.broadcast %26 : vector<8x1xf32> to vector<8x128xf32>
    %29 = vector.broadcast %27 : vector<1x128xf32> to vector<8x128xf32>
    %30 = arith.mulf %28, %29 : vector<8x128xf32>
    %31 = arith.addf %25, %30 : vector<8x128xf32>
    %c0_8 = arith.constant 0 : index
    %c0_9 = arith.constant 0 : index
    %c0_10 = arith.constant 0 : index
    %32 = vector.load %arg5[%c0_8, %c0_9, %c0_10] : memref<1x8x128xf32, #tpu.memory_space<vmem>>, vector<1x8x128xf32>
    %33 = vector.shape_cast %32 : vector<1x8x128xf32> to vector<8x128xf32>
    %34 = vector.shape_cast %31 : vector<8x128xf32> to vector<1x8x128xf32>
    tpu.vector_store %arg5[%c0_8, %c0_9, %c0_10], %34 {strides = array<i32>} : memref<1x8x128xf32, #tpu.memory_space<vmem>>, vector<1x8x128xf32>,
    return
  }
  func.func @transform_0(%arg0: i32, %arg1: i32) -> (i32, i32, i32) {
    %c0_i32 = arith.constant 0 : i32
    %c0_i32_0 = arith.constant 0 : i32
    %c0_i32_1 = arith.constant 0 : i32
    return %arg0, %c0_i32, %c0_i32_0 : i32, i32, i32
  }
  func.func @transform_1(%arg0: i32, %arg1: i32) -> (i32, i32, i32) {
    %c0_i32 = arith.constant 0 : i32
    %c0_i32_0 = arith.constant 0 : i32
    return %arg0, %c0_i32, %arg1 : i32, i32, i32
  }
  func.func @transform_2(%arg0: i32, %arg1: i32) -> (i32, i32, i32) {
    %c0_i32 = arith.constant 0 : i32
    %c0_i32_0 = arith.constant 0 : i32
    %c0_i32_1 = arith.constant 0 : i32
    return %arg0, %c0_i32, %c0_i32_0 : i32, i32, i32
  }
  func.func @transform_3(%arg0: i32, %arg1: i32) -> (i32, i32, i32) {
    %c0_i32 = arith.constant 0 : i32
    %c0_i32_0 = arith.constant 0 : i32
    return %arg0, %c0_i32, %arg1 : i32, i32, i32
  }
}

</mosaic_0001>

<bundles_post_ra>
// kernel: tpu_custom_call.1
= control target key start
LH: loop header
LB: loop body
LE: loop exit
PB: predicated region body
PF: predicated region fallthrough
CT: control target
= control target key end

     0   :  { %8 = vsyncpa [#allocation3], 0  ;;  %s754_s0 = inlined_call_operand.vmem [shape: f32[2,8,4], index: 0, kind: input, shape index: {}]   ;;  %s755_s1 = inlined_call_operand.vmem [shape: f32[2,4,256], index: 1, kind: input, shape index: {}]   ;;  %s756_s2 = inlined_call_operand.vmem [shape: f32[2,8,1], index: 2, kind: input, shape index: {}]   ;;  %s757_s3 = inlined_call_operand.hbm [shape: f32[2,8,256], index: 3, kind: output, shape index: {}]  }
   0x1   :  { %10 = vsyncpa [#allocation3 + $0x1], 0  ;;  %s611_s12 = smov 0   ;;  %s613_s13 = smov 0  }
   0x2   :  { %s615_s14 = smov 0   ;;  %s617_s15 = smov 0  }
   0x3   :  { %s619_s16 = smov 0   ;;  %s621_s17 = smov 0  }
   0x4   :  { %s623_s18 = smov 0   ;;  %s625_s19 = smov 0  }
   0x5 LB: > { %s396_s20 = sadd.s32 4294967295, %s584_s19   ;;  %s397_s21 = sadd.s32 4294967294, %s584_s19   ;;  %s584_s19 = sphi %s625_s19, %s16_s19   ;;  %s580_s18 = sphi %s623_s18, %s766_s18   ;;  %s576_s17 = sphi %s621_s17, %s765_s17   ;;  %s572_s16 = sphi %s619_s16, %s764_s16   ;;  %s568_s15 = sphi %s617_s15, %s763_s15   ;;  %s564_s14 = sphi %s615_s14, %s762_s14   ;;  %s560_s13 = sphi %s613_s13, %s761_s13   ;;  %s556_s12 = sphi %s611_s12, %s760_s12  }
   0x6   : > { %s25_s22 = sadd.s32 1, %s576_s17  ;;  %s28_s23 = sadd.s32 1, %s580_s18 }
   0x7   : > { %p26_p0 = scmp.ge.s32.totalorder %s25_s22, 2  ;;  %p127_p1 = scmp.ne.s32.totalorder %s564_s14, %s560_s13 }
   0x8   : > { %p128_p2 = scmp.eq.s32.totalorder %s396_s20, 3  ;;  %p133_p5 = scmp.ne.s32.totalorder %s560_s13, %s556_s12 }
   0x9   : > { %s768_s22 = smov (%p26_p0, %s25_s22), 0  ;;  %s770_s23 = smov (!%p26_p0, %s28_s23), %s580_s18 }
   0xa   : > { %s113_s24 = ssub.s32 %s576_s17, %s768_s22  ;;  %p662_p3 = por %p128_p2, %p127_p1 }
   0xb   : > { %p30_p4 = scmp.ge.s32.totalorder %s770_s23, 2  ;;  %p134_p6 = scmp.eq.s32.totalorder %s397_s21, 3 }
   0xc   : > { %p400_p7 = scmp.ge.s32.totalorder %s584_s19, 1  ;;  %p177_p9 = scmp.lt.s32.totalorder %s584_s19, 5 }
   0xd   : > { %s772_s23 = smov (%p30_p4, %s770_s23), 0  ;;  %p671_p8 = por %p134_p6, %p133_p5 }
   0xe   : > { %s112_s27 = ssub.s32 %s580_s18, %s772_s23  ;;  %s117_s28 = sadd.s32 1, %s564_s14 }
   0xf   : > { %s114_s29 = sor.u32 %s113_s24, %s112_s27  ;;  %p178_p10 = pnand %p400_p7, %p177_p9 }
  0x10   : > { %p115_p11 = scmp.eq.s32.totalorder %s114_s29, 0  ;;  %p212_p12 = scmp.lt.s32.totalorder (!%p178_p10), %s572_s16, 1  ;;  %v586_v0 = vmov (!%p178_p10), 0   ;;  %v587_v1 = vmov (!%p178_p10), 1   ;;  %v588_v4 = vmov (!%p178_p10), 2   ;;  %v589_v5 = vmov (!%p178_p10), 3  }
  0x11   : > { %181 = sbr.rel (%p178_p10) target bundleno = 184 (0xb8), region = 32  ;;  %486 = vset.pattern.permute.xlu0 (!%p178_p10), %v586_v0  ;;  %487 = vset.pattern.permute.xlu1 (!%p178_p10), %v587_v1  ;;  %p218_p13 = scmp.lt.s32.totalorder (!%p178_p10), %s568_s15, 1  ;;  %v241_v6 = vlaneseq (!%p178_p10) }
  0x12   : > { %s680_s30 = scalar_select %p115_p11, %s564_s14, %s117_s28  }
  0x13   : > { %v242_v7 = vshrl.u32 (!%p178_p10), %v241_v6, 7  ;;  %s209_s6 = sand.u32 (!%p178_p10), 1, %s560_s13   ;;  %s407_s7 = sshll.u32 (!%p178_p10), %s572_s16, 1 }
  0x15   : > { %v243_v8 = vsub.s32 (!%p178_p10), 0, %v242_v7  ;;  %v253_v10 = vsub.s32 (!%p178_p10), 1, %v242_v7  ;;  %v263_v11 = vsub.s32 (!%p178_p10), 2, %v242_v7  ;;  %v273_v17 = vsub.s32 (!%p178_p10), 3, %v242_v7 }
  0x18   : > { %s213_s4 = scalar_select %p212_p12, %s572_s16, 1 }
  0x19   : > { %s219_s20 = scalar_select %p218_p13, %s568_s15, 1 }
  0x1a   : > { %s402_s5 = sshll.u32 %s213_s4, 3  ;;  %s403_s21 = sshll.u32 %s213_s4, 1 }
  0x1b   : > { %s215_s8 = scalar_lea.vmem %s754_s0, %s402_s5  ;;  %s227_s11 = scalar_lea.vmem %s756_s2, %s402_s5 }
  0x1c   : > { %v228_v2 = vld [vmem:[%s215_s8] sm:$0xff]  ;;  %s221_s24 = sadd.s32 %s403_s21, %s219_s20  ;;  %s401_s4 = sshll.u32 %s209_s6, 3 }
  0x1d   : > { %238 = vperm.xlu0 %486, %v228_v2   ;;  %248 = vperm.xlu1 %487, %v228_v2   ;;  %v230_v3 = vld [vmem:[%s227_s11] sm:$0xff]  ;;  %s404_s27 = sshll.u32 %s221_s24, 2  ;;  %s290_s8 = sadd.s32 %s568_s15, %s407_s7 }
  0x1e   : > { %s223_s5 = scalar_lea.vmem %s755_s1, %s404_s27  ;;  %s408_s9 = sshll.u32 %s290_s8, 7 }
  0x1f   : > { %v229_v9 = vld [vmem:[%s223_s5] sm:$0xf]  ;;  %s211_s10 = scalar_lea.vmem [#allocation2], %s401_s4  ;;  %s701_s16 = scalar_lea.hbm %s757_s3, %s408_s9 }
  0x20   : > { %v244_v12 = vrot.slane %v229_v9, %v243_v8  ;;  %v254_v15 = vrot.slane %v229_v9, %v253_v10  ;;  %v264_v16 = vrot.slane %v229_v9, %v263_v11  ;;  %v274_v24 = vrot.slane %v229_v9, %v273_v17  ;;  %s294_s11 = sshll.u32 %s211_s10, 4  ;;  %s279_s15 = scalar_lea.sflag [#allocation3], %s209_s6  ;;  %s703_s11 = int_to_ptr.vmem [resolvable:$true] %s294_s11 }
  0x21   : > { %233 = vperm.xlu0 %486, %v230_v3   ;;  %488 = vset.pattern.permute.xlu1 %v588_v4  ;;  %s490_s24 = scalar_lea.vmem %s703_s11, 128  ;;  %s590_s27 = smov [#allocation2]  }
  0x22   : > { %258 = vperm.xlu1 %488, %v228_v2   ;;  %p491_p0 = scmp.ne.s32.totalorder %s703_s11, %s490_s24  ;;  %s494_s28 = sshll.u32 %s590_s27, 4  ;;  %s495_s28 = int_to_ptr.vmem [resolvable:$false] %s494_s28 }
  0x23   : > { %s496_s29 = scalar_lea.vmem %s495_s28, 256  ;;  %p497_p4 = scmp.lt.s32.totalorder %s703_s11, %s495_s28 }
  0x24   : > { %p492_p1 = pnand %p491_p0, %p662_p3  ;;  %p498_p5 = scmp.lt.s32.totalorder %s496_s29, %s490_s24 }
  0x25   : > { %489 = vset.pattern.permute.xlu0 %v589_v5 }
  0x26   : > { %268 = vperm.xlu0 %489, %v228_v2   ;;  %p493_p2 = pneg %p492_p1  ;;  %p499_p6 = por %p498_p5, %p497_p4 }
  0x28   : > { %p500_p7 = pnand %p499_p6, %p493_p2 }
  0x9c   : > { %v239_v13 = vpop.permute.xlu0 %238  ;;  %v249_v14 = vpop.permute.xlu1 %248 }
  0x9d   : > { %v245_v18 = vmul.f32 %v244_v12, %v239_v13  ;;  %v255_v20 = vmul.f32 %v254_v15, %v249_v14 }
  0xa0   : > { %v234_v19 = vpop.permute.xlu0 %233 }
  0xa1   : > { %v246_v21 = vadd.f32 %v245_v18, %v234_v19  ;;  %v259_v22 = vpop.permute.xlu1 %258 }
  0xa2   : > { %v265_v23 = vmul.f32 %v264_v16, %v259_v22 }
  0xa3   : > { %v256_v25 = vadd.f32 %v255_v20, %v246_v21 }
  0xa5   : > { %v266_v26 = vadd.f32 %v265_v23, %v256_v25  ;;  %v269_v27 = vpop.permute.xlu0 %268 }
  0xa6   : > { %v275_v28 = vmul.f32 %v274_v24, %v269_v27 }
  0xa8   : > { %v276_v29 = vadd.f32 %v275_v28, %v266_v26 }
  0xaa   : > { %277 = vst [vmem:[%s211_s10] sm:$0xff] %v276_v29 }
  0xab   : > { %503 = shalt.err (!%p500_p7)
}
  0xac   : > { %s504_s5 = scalar_lea.hbm %s701_s16, 128  ;;  %s508_s7 = scalar_lea.hbm %s757_s3, 512 }
  0xad   : > { %p505_p9 = scmp.ne.s32.totalorder %s701_s16, %s504_s5  ;;  %p509_p12 = scmp.lt.u32.totalorder %s701_s16, %s757_s3 }
  0xae   : > { %p510_p13 = scmp.lt.u32.totalorder %s508_s7, %s504_s5  ;;  %p512_p1 = scmp.lt.u32.totalorder %s504_s5, %s701_s16 }
  0xaf   : > { %p506_p10 = pnand %p505_p9, %p662_p3 }
  0xb0   : > { %p511_p0 = por %p510_p13, %p509_p12 }
  0xb1   : > { %p507_p11 = pneg %p506_p10 }
  0xb2   : > { %p513_p2 = por %p512_p1, %p511_p0 }
  0xb4   : > { %p514_p4 = pnand %p513_p2, %p507_p11 }
  0xb6   : > { %517 = shalt.err (!%p514_p4)
}
  0xb7   : > { %411 = dma.vmem_to_hbm [thread:$0]  (%p662_p3), %s703_s11, 128, %s701_s16, %s279_s15  }
  0xb8 PF: > { %p417_p5 = scmp.ge.s32.totalorder %s584_s19, 2  ;;  %s306_s10 = sand.u32 1, %s556_s12  }
  0xb9   : > { %s307_s20 = scalar_lea.sflag [#allocation3], %s306_s10 }
  0xba   : > { %p414_p6 = pnand %p417_p5, %p671_p8 }
  0xbc   : > { %551 = dma.done.wait (!%p414_p6), %s307_s20, 128  }
  0xbd   : > { %553 = vsyncadd (!%p414_p6), %s307_s20, 4294967168  ;;  %s16_s19 = sadd.s32 1, %s584_s19   ;;  %s760_s12 = smov %s560_s13 }
  0xbe   : > { %p13_p7 = scmp.ge.s32.totalorder %s16_s19, 6   ;;  %s761_s13 = smov %s564_s14 }
  0xbf   : > { %s762_s14 = smov %s680_s30  ;;  %s763_s15 = smov %s576_s17 }
  0xc0   : > { %s764_s16 = smov %s580_s18  ;;  %s765_s17 = smov %s768_s22 }
  0xc1   : > { %s766_s18 = smov %s772_s23  ;;  %15 = sbr.rel (!%p13_p7) target bundleno = 5 (0x5), region = 73 }
  0xc8   :  { %312 = vsyncpa [#allocation3], 1 }
  0xc9   :  { %314 = vsyncpa [#allocation3 + $0x1], 1 }

</bundles_post_ra>
